<compile_context>
chip_gen: v5e
topology: v5e:2x2
jax: 0.10.0
libtpu: 0.0.40
codegen_flags: <defaults>
</compile_context>

<pallas_src>
import jax
import jax.numpy as jnp
from jax.experimental import pallas as pl
from jax.experimental.pallas import tpu as pltpu

_LANE = 128
_MAX_DMA_CHUNKS = 4          # overlap up to 4 DMA descriptors on big copies
_MIN_CHUNK_BYTES = 1 << 20   # don't bother chunking below ~1 MiB per chunk


def _lane_dense_slab(x, total):
    """Reshape the flat buffer into (rows, L) with L the widest multiple of
    128 that divides `total` (capped at 4096 lanes) — lane-dense DMA shape."""
    q = total // _LANE
    factor = 1
    for cand in (32, 16, 8, 4, 2, 1):
        if q % cand == 0:
            factor = cand
            break
    lanes = _LANE * factor
    return x.reshape(total // lanes, lanes)


def _make_dma_copy_kernel(bounds):
    """Build a kernel that copies (rows, lanes) HBM→HBM via chunked DMAs.

    `bounds` is a static tuple of (row_start, row_count) chunks.  All copies
    are started back-to-back (so the DMA engines overlap) and then waited.
    """
    def kernel(x_ref, o_ref, sems):
        copies = []
        for i, (start, size) in enumerate(bounds):
            cp = pltpu.make_async_copy(
                x_ref.at[pl.ds(start, size), :],
                o_ref.at[pl.ds(start, size), :],
                sems.at[i],
            )
            cp.start()
            copies.append(cp)
        for cp in copies:
            cp.wait()
    return kernel


def _pallas_dma_copy(flat2d):
    """Copy a lane-dense (rows, lanes) slab via direct HBM→HBM DMA."""
    rows, lanes = flat2d.shape
    itemsize = jnp.dtype(flat2d.dtype).itemsize
    total_bytes = rows * lanes * itemsize

    # Up to 4 overlapping DMA descriptors, each at least ~1 MiB; small inputs
    # get a single descriptor.  Chunk bounds are static (trace-time Python).
    n_chunks = max(1, min(_MAX_DMA_CHUNKS, rows, total_bytes // _MIN_CHUNK_BYTES))
    base, rem = divmod(rows, n_chunks)
    bounds, start = [], 0
    for i in range(n_chunks):
        size = base + (1 if i < rem else 0)
        if size > 0:
            bounds.append((start, size))
            start += size
    bounds = tuple(bounds)

    return pl.pallas_call(
        _make_dma_copy_kernel(bounds),
        out_shape=jax.ShapeDtypeStruct((rows, lanes), flat2d.dtype),
        in_specs=[pl.BlockSpec(memory_space=pl.ANY)],   # raw HBM ref
        out_specs=pl.BlockSpec(memory_space=pl.ANY),    # raw HBM ref
        scratch_shapes=[pltpu.SemaphoreType.DMA((len(bounds),))],
        cost_estimate=pl.CostEstimate(
            flops=0, transcendentals=0, bytes_accessed=2 * total_bytes),
    )(flat2d)


def _resolve_shape(total, shape):
    """torch .view shape semantics, including a single -1 with validation."""
    shape = list(shape)
    neg = [i for i, s in enumerate(shape) if s == -1]
    if len(neg) > 1:
        raise ValueError("only one dimension can be inferred (-1)")
    if neg:
        known = 1
        for j, s in enumerate(shape):
            if j != neg[0]:
                known *= s
        if known == 0 or total % known != 0:
            raise ValueError(
                f"shape {tuple(shape)} is invalid for input of size {total}")
        shape[neg[0]] = total // known
    out_total = 1
    for s in shape:
        out_total *= s
    if out_total != total:
        raise ValueError(
            f"shape {tuple(shape)} is invalid for input of size {total}")
    return tuple(shape)


def reshape_forward(x, *shape, use_pallas_copy=False):
    """Equivalent of Reshape(*shape)(x) == x.view(*shape).

    Default path: metadata-only `jnp.reshape` — the correct cost model for a
    contiguous .view (no HBM traffic, no kernel).  Set `use_pallas_copy=True`
    to route the bytes through the Pallas HBM→HBM DMA copy kernel (e.g. to
    force/benchmark a kernel boundary).
    """
    total = x.size
    shape = _resolve_shape(total, shape)

    if not use_pallas_copy or total == 0 or total % _LANE != 0:
        # Free reinterpretation; also the fallback for ragged/empty sizes.
        return jnp.reshape(x, shape)

    flat2d = _lane_dense_slab(x, total)
    copied = _pallas_dma_copy(flat2d)
    return copied.reshape(shape)


if __name__ == "__main__":
    key = jax.random.PRNGKey(0)
    # NCHW input, as a PyTorch conv stack would feed this Reshape module.
    B, C, H, W = 2, 4, 16, 16
    x = jax.random.normal(key, (B, C, H, W), dtype=jnp.float32)

    target_shape = (B, C, H * W)
    ref = x.reshape(target_shape)

    # 1) Default (recommended) path: metadata-only view, no kernel.
    out_fast = jax.block_until_ready(reshape_forward(x, *target_shape))
    assert out_fast.shape == ref.shape and out_fast.dtype == ref.dtype
    assert bool(jnp.array_equal(out_fast, ref))

    # 2) Pallas kernel path: direct HBM->HBM DMA copy, run once on TPU.
    out_kernel = jax.block_until_ready(
        reshape_forward(x, *target_shape, use_pallas_copy=True))
    assert out_kernel.shape == ref.shape and out_kernel.dtype == ref.dtype
    assert bool(jnp.array_equal(out_kernel, ref))

    # 3) -1 inference path (torch-style), through the kernel as well.
    out_neg = jax.block_until_ready(
        reshape_forward(x, B, -1, use_pallas_copy=True))
    assert out_neg.shape == (B, C * H * W)
    assert bool(jnp.array_equal(out_neg, x.reshape(B, -1)))

    # 4) Invalid shape must raise (torch .view semantics).
    try:
        reshape_forward(x, B, 7, -1)
        raise AssertionError("expected ValueError for incompatible view shape")
    except ValueError:
        pass

    print("KERNEL_OK")
</pallas_src>

<mosaic_0001>
module attributes {stable_mosaic.version = 11 : i64} {
  func.func @kernel(%arg0: memref<1x2048xf32, #tpu.memory_space<any>>, %arg1: memref<1x2048xf32, #tpu.memory_space<any>>, %arg2: memref<1x!tpu.dma_semaphore, #tpu.memory_space<semaphore_mem>>) attributes {dimension_semantics = [], scalar_prefetch = 0 : i64, scratch_operands = 1 : i64, tpu.core_type = #tpu.core_type<tc>} {
    %c0_i32 = arith.constant 0 : i32
    %c0_i32_0 = arith.constant 0 : i32
    %c0_i32_1 = arith.constant 0 : i32
    %0 = tpu.memref_slice %arg0[%c0_i32_0, %c0_i32_1] : memref<1x2048xf32, #tpu.memory_space<any>> -> memref<1x2048xf32, #tpu.memory_space<any>>
    %c0_i32_2 = arith.constant 0 : i32
    %c0_i32_3 = arith.constant 0 : i32
    %1 = tpu.memref_slice %arg1[%c0_i32_2, %c0_i32_3] : memref<1x2048xf32, #tpu.memory_space<any>> -> memref<1x2048xf32, #tpu.memory_space<any>>
    %2 = tpu.memref_slice %arg2[%c0_i32] : memref<1x!tpu.dma_semaphore, #tpu.memory_space<semaphore_mem>> -> memref<1x!tpu.dma_semaphore, #tpu.memory_space<semaphore_mem>>
    %3 = tpu.memref_squeeze %2 : memref<1x!tpu.dma_semaphore, #tpu.memory_space<semaphore_mem>> -> memref<!tpu.dma_semaphore, #tpu.memory_space<semaphore_mem>>
    tpu.enqueue_dma source(%0 : memref<1x2048xf32, #tpu.memory_space<any>>) target(%1 : memref<1x2048xf32, #tpu.memory_space<any>>) target_semaphore(%3 : memref<!tpu.dma_semaphore, #tpu.memory_space<semaphore_mem>>)
    %c0_i32_4 = arith.constant 0 : i32
    %c0_i32_5 = arith.constant 0 : i32
    %c0_i32_6 = arith.constant 0 : i32
    %4 = tpu.memref_slice %arg0[%c0_i32_5, %c0_i32_6] : memref<1x2048xf32, #tpu.memory_space<any>> -> memref<1x2048xf32, #tpu.memory_space<any>>
    %c0_i32_7 = arith.constant 0 : i32
    %c0_i32_8 = arith.constant 0 : i32
    %5 = tpu.memref_slice %arg1[%c0_i32_7, %c0_i32_8] : memref<1x2048xf32, #tpu.memory_space<any>> -> memref<1x2048xf32, #tpu.memory_space<any>>
    %6 = tpu.memref_slice %arg2[%c0_i32_4] : memref<1x!tpu.dma_semaphore, #tpu.memory_space<semaphore_mem>> -> memref<1x!tpu.dma_semaphore, #tpu.memory_space<semaphore_mem>>
    %7 = tpu.memref_squeeze %6 : memref<1x!tpu.dma_semaphore, #tpu.memory_space<semaphore_mem>> -> memref<!tpu.dma_semaphore, #tpu.memory_space<semaphore_mem>>
    tpu.wait_dma2 semaphore(%7 : memref<!tpu.dma_semaphore, #tpu.memory_space<semaphore_mem>>) src(%4 : memref<1x2048xf32, #tpu.memory_space<any>>) dst(%5 : memref<1x2048xf32, #tpu.memory_space<any>>)
    return
  }
}

</mosaic_0001>

<bundles_post_ra>
// kernel: tpu_custom_call.1
= control target key start
LH: loop header
LB: loop body
LE: loop exit
PB: predicated region body
PF: predicated region fallthrough
CT: control target
= control target key end

     0   :  { %s32_s12 = smov [#allocation2]   ;;  %s33_s13 = smov [#allocation3]   ;;  %s51_s0 = inlined_call_operand.hbm [shape: f32[1,2048], index: 0, kind: input, shape index: {}]   ;;  %s52_s1 = inlined_call_operand.hbm [shape: f32[1,2048], index: 1, kind: output, shape index: {}]  }
   0x1   :  { %s10_s8 = sshll.u32 %s51_s0, 4  ;;  %s12_s11 = sshll.u32 %s52_s1, 4  ;;  %s11_s8 = int_to_ptr.hbm [resolvable:$true] %s10_s8  ;;  %s13_s11 = int_to_ptr.hbm [resolvable:$true] %s12_s11 }
   0x2   :  { %s34_s14 = smov 0  }
   0x3   :  { %16 = dma.general %s11_s8, 256, %s13_s11, %s32_s12, %s33_s13, [#allocation4], %s34_s14, 0  }
   0x4   :  { %30 = dma.done.wait [#allocation2], 256 }
   0x5   :  { %31 = vsyncadd [#allocation2], 4294967040 }
   0x6   :  { %20 = vsyncmov [#allocation2] }
   0x9   :  { %s21_s15 = vpop.sfrf %20 }
   0xa   :  { %p26_p0 = scmp.ne.s32.totalorder %s21_s15, 0 }
   0xc   :  { %25 = shalt.err (%p26_p0)  }

</bundles_post_ra>
